<compile_context>
chip_gen: v5e
topology: v5e:2x2
jax: 0.10.0
libtpu: 0.0.40
codegen_flags: <defaults>
</compile_context>

<pallas_src>
import math
import functools

import jax
import jax.numpy as jnp
from jax.experimental import pallas as pl
from jax.experimental.pallas import tpu as pltpu

# ------------------------- model hyper-parameters -------------------------
D_MODEL = 32
HEADS = 4
D_K = D_MODEL // HEADS


# ------------------------------ kernel helpers ------------------------------

def _attention_core(q2d, k2d, v2d, mask, ctx_ref, wo_ref, bo_ref, out_ref,
                    *, heads, d_k):
    """Scaled-dot-product attention for one batch element.

    q2d: (Sq, D) f32 (1/sqrt(d_k) already folded into the Q projection)
    k2d, v2d: (Sk, D) f32
    mask: (Sq, Sk) f32 or None     ctx_ref: (Sq, D) bf16 VMEM scratch
    wo_ref: (D, D) bf16            bo_ref: (1, D) f32
    out_ref: (1, Sq, D) f32
    """
    for h in range(heads):
        sl = slice(h * d_k, (h + 1) * d_k)
        qh = q2d[:, sl].astype(jnp.bfloat16)
        kh = k2d[:, sl].astype(jnp.bfloat16)
        vh = v2d[:, sl].astype(jnp.bfloat16)

        # scores = Q K^T  (softmax scale already baked into the Q projection)
        s = jax.lax.dot_general(qh, kh, (((1,), (1,)), ((), ())),
                                preferred_element_type=jnp.float32)  # (Sq, Sk)
        if mask is not None:
            s = jnp.where(mask == 0.0, jnp.float32(-1e9), s)  # masked_fill
        # f32 softmax path (no bf16 VPU/EUP ops -> v5e-safe)
        s = s - jnp.max(s, axis=-1, keepdims=True)
        e = jnp.exp(s)
        inv = pl.reciprocal(jnp.sum(e, axis=-1, keepdims=True), approx=True)
        p = (e * inv).astype(jnp.bfloat16)
        # TODO(synk): nn.Dropout on p is identity here (eval mode); a train-mode
        # variant would use pltpu.prng_seed / pltpu.prng_random_bits.

        # context for this head, written at its static lane offset.
        ctx_ref[:, sl] = jnp.dot(p, vh, preferred_element_type=jnp.float32
                                 ).astype(ctx_ref.dtype)

    # Output projection from the assembled (Sq, D) context.
    out = jnp.dot(ctx_ref[...], wo_ref[...],
                  preferred_element_type=jnp.float32) + bo_ref[...]
    out_ref[0] = out


def _mha_fused_kernel(*args, heads, d_k, has_mask):
    """Self-attention path: one fat x @ W_qkv projection (N = 3D)."""
    if has_mask:
        x_ref, mask_ref, w_qkv_ref, b_qkv_ref, wo_ref, bo_ref, out_ref, ctx_ref = args
    else:
        x_ref, w_qkv_ref, b_qkv_ref, wo_ref, bo_ref, out_ref, ctx_ref = args
        mask_ref = None
    D = heads * d_k

    x = x_ref[0]                                              # (S, D) bf16
    qkv = jnp.dot(x, w_qkv_ref[...],
                  preferred_element_type=jnp.float32) + b_qkv_ref[...]  # (S, 3D) f32
    mask = mask_ref[0] if has_mask else None
    _attention_core(qkv[:, :D], qkv[:, D:2 * D], qkv[:, 2 * D:],
                    mask, ctx_ref, wo_ref, bo_ref, out_ref,
                    heads=heads, d_k=d_k)


def _mha_general_kernel(*args, heads, d_k, has_mask):
    """Distinct query/key/value inputs: column slices of the packed weight."""
    if has_mask:
        (xq_ref, xk_ref, xv_ref, mask_ref,
         w_qkv_ref, b_qkv_ref, wo_ref, bo_ref, out_ref, ctx_ref) = args
    else:
        (xq_ref, xk_ref, xv_ref,
         w_qkv_ref, b_qkv_ref, wo_ref, bo_ref, out_ref, ctx_ref) = args
        mask_ref = None
    D = heads * d_k

    w = w_qkv_ref[...]
    b = b_qkv_ref[...]
    q2d = jnp.dot(xq_ref[0], w[:, :D],
                  preferred_element_type=jnp.float32) + b[:, :D]
    k2d = jnp.dot(xk_ref[0], w[:, D:2 * D],
                  preferred_element_type=jnp.float32) + b[:, D:2 * D]
    v2d = jnp.dot(xv_ref[0], w[:, 2 * D:],
                  preferred_element_type=jnp.float32) + b[:, 2 * D:]
    mask = mask_ref[0] if has_mask else None
    _attention_core(q2d, k2d, v2d, mask, ctx_ref, wo_ref, bo_ref, out_ref,
                    heads=heads, d_k=d_k)


# ------------------------------ wrapper ------------------------------

def multi_head_attention(query, key, value, mask, params, *, heads=HEADS):
    """query: (B, Sq, D); key/value: (B, Sk, D); mask broadcastable to (B, Sq, Sk)."""
    B, Sq, D = query.shape
    Sk = key.shape[1]
    d_k = D // heads
    scale = 1.0 / math.sqrt(d_k)

    # Fused QKV projection is valid when the same tensor feeds all three
    # projections (self-attention).  Under jit this is a tracer-identity check.
    fused = (query is key) and (key is value)

    # --- one-time parameter prep (outside the kernel) ---
    # nn.Linear: y = x @ W.T + b with W (out, in).  Pre-transpose to (in, out),
    # fold the 1/sqrt(d_k) scale into the Q projection, pack Q|K|V weights
    # into one (D, 3D) slab, cast MXU operands to bf16 (biases stay f32).
    wq_t = (params["wq"] * scale).T
    w_qkv = jnp.concatenate([wq_t, params["wk"].T, params["wv"].T],
                            axis=1).astype(jnp.bfloat16)                 # (D, 3D)
    b_qkv = jnp.concatenate([params["bq"] * scale, params["bk"], params["bv"]]
                            )[None, :].astype(jnp.float32)               # (1, 3D)
    wo_t = params["wo"].T.astype(jnp.bfloat16)                           # (D, D)
    bo = params["bo"][None, :].astype(jnp.float32)                       # (1, D)

    # Mask is passed as-is (no precomputed additive bias); a batch-shared mask
    # stays un-broadcast and the index_map pins it to block 0 every step.
    has_mask = mask is not None
    mask_specs, mask_args = [], []
    if has_mask:
        m = jnp.asarray(mask, jnp.float32)
        if m.ndim == 2:
            m = m[None]
        Bm = m.shape[0]
        m = jnp.broadcast_to(m, (Bm, Sq, Sk))
        mask_map = (lambda b: (b, 0, 0)) if Bm > 1 else (lambda b: (0, 0, 0))
        mask_specs = [pl.BlockSpec((1, Sq, Sk), mask_map)]
        mask_args = [m]

    weight_specs = [
        pl.BlockSpec((D, 3 * D), lambda b: (0, 0)),
        pl.BlockSpec((1, 3 * D), lambda b: (0, 0)),
        pl.BlockSpec((D, D), lambda b: (0, 0)),
        pl.BlockSpec((1, D), lambda b: (0, 0)),
    ]
    weight_args = [w_qkv, b_qkv, wo_t, bo]

    if fused:
        kernel = functools.partial(_mha_fused_kernel,
                                   heads=heads, d_k=d_k, has_mask=has_mask)
        in_specs = ([pl.BlockSpec((1, Sq, D), lambda b: (b, 0, 0))]
                    + mask_specs + weight_specs)
        args = [query.astype(jnp.bfloat16)] + mask_args + weight_args
    else:
        kernel = functools.partial(_mha_general_kernel,
                                   heads=heads, d_k=d_k, has_mask=has_mask)
        in_specs = ([pl.BlockSpec((1, Sq, D), lambda b: (b, 0, 0)),
                     pl.BlockSpec((1, Sk, D), lambda b: (b, 0, 0)),
                     pl.BlockSpec((1, Sk, D), lambda b: (b, 0, 0))]
                    + mask_specs + weight_specs)
        args = [query.astype(jnp.bfloat16),
                key.astype(jnp.bfloat16),
                value.astype(jnp.bfloat16)] + mask_args + weight_args

    # Advisory cost hint for XLA's scheduler.
    flops = 2 * B * (Sq * D * 3 * D            # QKV projections
                     + heads * 2 * Sq * Sk * d_k  # QK^T + PV
                     + Sq * D * D)             # output projection
    transcendentals = B * heads * Sq * (Sk + 1)
    bytes_accessed = int(sum(a.size * a.dtype.itemsize for a in args)
                         + B * Sq * D * 4)

    # TODO(synk): for long sequences, replace the per-batch fully-resident
    # (Sq, Sk) score tile with Sq/Sk BlockSpec tiling + online softmax
    # (flash-style m/l/acc scratch); mandatory on v7x's 64 MiB VMEM.
    return pl.pallas_call(
        kernel,
        out_shape=jax.ShapeDtypeStruct((B, Sq, D), jnp.float32),
        grid_spec=pltpu.PrefetchScalarGridSpec(
            num_scalar_prefetch=0,
            grid=(B,),
            in_specs=in_specs,
            out_specs=pl.BlockSpec((1, Sq, D), lambda b: (b, 0, 0)),
            scratch_shapes=[pltpu.VMEM((Sq, D), jnp.bfloat16)]),
        compiler_params=pltpu.CompilerParams(
            dimension_semantics=("parallel",)),
        cost_estimate=pl.CostEstimate(flops=flops,
                                      transcendentals=transcendentals,
                                      bytes_accessed=bytes_accessed),
    )(*args)


# ------------------------- reference (pure JAX) -------------------------

def mha_reference(query, key, value, mask, params, heads=HEADS):
    B, Sq, D = query.shape
    Sk = key.shape[1]
    d_k = D // heads

    def lin(x, w, b):
        return x @ w.T + b

    q = lin(query, params["wq"], params["bq"]).reshape(B, Sq, heads, d_k).transpose(0, 2, 1, 3)
    k = lin(key, params["wk"], params["bk"]).reshape(B, Sk, heads, d_k).transpose(0, 2, 1, 3)
    v = lin(value, params["wv"], params["bv"]).reshape(B, Sk, heads, d_k).transpose(0, 2, 1, 3)
    s = jnp.einsum('bhqd,bhkd->bhqk', q, k) / math.sqrt(d_k)
    if mask is not None:
        m = jnp.broadcast_to(mask, (B, Sq, Sk))[:, None]
        s = jnp.where(m == 0, -1e9, s)
    p = jax.nn.softmax(s, axis=-1)
    ctx = jnp.einsum('bhqk,bhkd->bhqd', p, v).transpose(0, 2, 1, 3).reshape(B, Sq, D)
    return lin(ctx, params["wo"], params["bo"])


# ---------------------------- parameter set-up ----------------------------

def _init_linear(key, out_dim, in_dim):
    kw, kb = jax.random.split(key)
    w = jax.random.normal(kw, (out_dim, in_dim), jnp.float32) * 0.05
    b = jax.random.normal(kb, (out_dim,), jnp.float32) * 0.01
    return w, b


def init_params(key):
    ks = jax.random.split(key, 4)
    wq, bq = _init_linear(ks[0], D_MODEL, D_MODEL)
    wk, bk = _init_linear(ks[1], D_MODEL, D_MODEL)
    wv, bv = _init_linear(ks[2], D_MODEL, D_MODEL)
    wo, bo = _init_linear(ks[3], D_MODEL, D_MODEL)
    return dict(wq=wq, bq=bq, wk=wk, bk=bk, wv=wv, bv=bv, wo=wo, bo=bo)


# ----------------------------------- main -----------------------------------

if __name__ == "__main__":
    B, S = 2, 8

    root = jax.random.PRNGKey(0)
    k_p, k_x, k_q, k_k, k_v = jax.random.split(root, 5)

    params = init_params(k_p)
    mask = jnp.broadcast_to(jnp.tril(jnp.ones((S, S), jnp.float32))[None], (B, S, S))

    # 1) Self-attention (query is key is value) -> fused (D, 3D) QKV projection.
    x = jax.random.normal(k_x, (B, S, D_MODEL), jnp.float32)
    self_attn = jax.jit(lambda x, m, p: multi_head_attention(x, x, x, m, p))
    out_self = jax.block_until_ready(self_attn(x, mask, params))
    assert out_self.shape == (B, S, D_MODEL), out_self.shape
    assert bool(jnp.all(jnp.isfinite(out_self)))
    ref_self = mha_reference(x, x, x, mask, params)
    err_self = float(jnp.max(jnp.abs(out_self - ref_self)))
    assert bool(jnp.allclose(out_self, ref_self, rtol=2e-2, atol=2e-2)), err_self

    # 2) Distinct query/key/value (cross-attention style) -> general path.
    q = jax.random.normal(k_q, (B, S, D_MODEL), jnp.float32)
    k = jax.random.normal(k_k, (B, S, D_MODEL), jnp.float32)
    v = jax.random.normal(k_v, (B, S, D_MODEL), jnp.float32)
    cross_attn = jax.jit(multi_head_attention)
    out_cross = jax.block_until_ready(cross_attn(q, k, v, mask, params))
    assert out_cross.shape == (B, S, D_MODEL), out_cross.shape
    assert bool(jnp.all(jnp.isfinite(out_cross)))
    ref_cross = mha_reference(q, k, v, mask, params)
    err_cross = float(jnp.max(jnp.abs(out_cross - ref_cross)))
    assert bool(jnp.allclose(out_cross, ref_cross, rtol=2e-2, atol=2e-2)), err_cross

    print("KERNEL_OK")
</pallas_src>

<mosaic_0001>
module attributes {stable_mosaic.version = 11 : i64} {
  func.func @_mha_fused_kernel(%arg0: i32, %arg1: memref<1x8x32xbf16, #tpu.memory_space<vmem>>, %arg2: memref<1x8x8xf32, #tpu.memory_space<vmem>>, %arg3: memref<32x96xbf16, #tpu.memory_space<vmem>>, %arg4: memref<1x96xf32, #tpu.memory_space<vmem>>, %arg5: memref<32x32xbf16, #tpu.memory_space<vmem>>, %arg6: memref<1x32xf32, #tpu.memory_space<vmem>>, %arg7: memref<1x8x32xf32, #tpu.memory_space<vmem>>, %arg8: memref<8x32xbf16, #tpu.memory_space<vmem>>) attributes {dimension_semantics = [#tpu.dimension_semantics<parallel>], iteration_bounds = array<i64: 2>, scalar_prefetch = 0 : i64, scratch_operands = 1 : i64, tpu.core_type = #tpu.core_type<tc>, window_params = [{transform_indices = @transform_0, window_bounds = array<i64: 1, 8, 32>}, {transform_indices = @transform_1, window_bounds = array<i64: 1, 8, 8>}, {pipeline_mode = #tpu.pipeline_mode<synchronous>, transform_indices = @transform_2, window_bounds = array<i64: 32, 96>}, {pipeline_mode = #tpu.pipeline_mode<synchronous>, transform_indices = @transform_3, window_bounds = array<i64: 1, 96>}, {pipeline_mode = #tpu.pipeline_mode<synchronous>, transform_indices = @transform_4, window_bounds = array<i64: 32, 32>}, {pipeline_mode = #tpu.pipeline_mode<synchronous>, transform_indices = @transform_5, window_bounds = array<i64: 1, 32>}, {transform_indices = @transform_6, window_bounds = array<i64: 1, 8, 32>}]} {
    %c0 = arith.constant 0 : index
    %c0_0 = arith.constant 0 : index
    %c0_1 = arith.constant 0 : index
    %0 = vector.load %arg1[%c0, %c0_0, %c0_1] : memref<1x8x32xbf16, #tpu.memory_space<vmem>>, vector<1x8x32xbf16>
    %1 = vector.shape_cast %0 : vector<1x8x32xbf16> to vector<8x32xbf16>
    %c0_2 = arith.constant 0 : index
    %c0_3 = arith.constant 0 : index
    %2 = vector.load %arg3[%c0_2, %c0_3] : memref<32x96xbf16, #tpu.memory_space<vmem>>, vector<32x96xbf16>
    %cst = arith.constant dense<0.000000e+00> : vector<8x96xf32>
    %3 = tpu.matmul %1, %2, %cst {dimension_numbers = #tpu.dot_dimension_numbers<[1], [0], [0], [1], [0, 0, 1, 1], [], []>} : vector<8x32xbf16>, vector<32x96xbf16>, vector<8x96xf32> -> vector<8x96xf32>
    %c0_4 = arith.constant 0 : index
    %c0_5 = arith.constant 0 : index
    %4 = vector.load %arg4[%c0_4, %c0_5] : memref<1x96xf32, #tpu.memory_space<vmem>>, vector<1x96xf32>
    %5 = vector.broadcast %4 : vector<1x96xf32> to vector<8x96xf32>
    %6 = arith.addf %3, %5 : vector<8x96xf32>
    %c0_6 = arith.constant 0 : index
    %c0_7 = arith.constant 0 : index
    %c0_8 = arith.constant 0 : index
    %7 = vector.load %arg2[%c0_6, %c0_7, %c0_8] : memref<1x8x8xf32, #tpu.memory_space<vmem>>, vector<1x8x8xf32>
    %8 = vector.shape_cast %7 : vector<1x8x8xf32> to vector<8x8xf32>
    %9 = vector.extract_strided_slice %6 {offsets = [0, 0], sizes = [8, 32], strides = [1, 1]} : vector<8x96xf32> to vector<8x32xf32>
    %10 = vector.extract_strided_slice %6 {offsets = [0, 32], sizes = [8, 32], strides = [1, 1]} : vector<8x96xf32> to vector<8x32xf32>
    %11 = vector.extract_strided_slice %6 {offsets = [0, 64], sizes = [8, 32], strides = [1, 1]} : vector<8x96xf32> to vector<8x32xf32>
    %12 = vector.extract_strided_slice %9 {offsets = [0, 0], sizes = [8, 8], strides = [1, 1]} : vector<8x32xf32> to vector<8x8xf32>
    %13 = arith.truncf %12 : vector<8x8xf32> to vector<8x8xbf16>
    %14 = vector.extract_strided_slice %10 {offsets = [0, 0], sizes = [8, 8], strides = [1, 1]} : vector<8x32xf32> to vector<8x8xf32>
    %15 = arith.truncf %14 : vector<8x8xf32> to vector<8x8xbf16>
    %16 = vector.extract_strided_slice %11 {offsets = [0, 0], sizes = [8, 8], strides = [1, 1]} : vector<8x32xf32> to vector<8x8xf32>
    %17 = arith.truncf %16 : vector<8x8xf32> to vector<8x8xbf16>
    %cst_9 = arith.constant dense<0.000000e+00> : vector<8x8xf32>
    %18 = tpu.matmul %13, %15, %cst_9 {dimension_numbers = #tpu.dot_dimension_numbers<[1], [1], [0], [0], [0, 0, 1, 0], [], []>} : vector<8x8xbf16>, vector<8x8xbf16>, vector<8x8xf32> -> vector<8x8xf32>
    %cst_10 = arith.constant 0.000000e+00 : f32
    %19 = vector.broadcast %cst_10 : f32 to vector<8x8xf32>
    %20 = arith.cmpf oeq, %8, %19 : vector<8x8xf32>
    %cst_11 = arith.constant -1.000000e+09 : f32
    %21 = vector.broadcast %cst_11 : f32 to vector<8x8xf32>
    %22 = arith.select %20, %21, %18 : vector<8x8xi1>, vector<8x8xf32>
    %cst_12 = arith.constant dense<0xFF800000> : vector<8xf32>
    %23 = vector.multi_reduction <maximumf>, %22, %cst_12 [1] : vector<8x8xf32> to vector<8xf32>
    %24 = vector.shape_cast %23 : vector<8xf32> to vector<8x1xf32>
    %25 = vector.broadcast %24 : vector<8x1xf32> to vector<8x8xf32>
    %26 = arith.subf %22, %25 : vector<8x8xf32>
    %27 = math.exp %26 : vector<8x8xf32>
    %cst_13 = arith.constant dense<0.000000e+00> : vector<8xf32>
    %28 = vector.multi_reduction <add>, %27, %cst_13 [1] : vector<8x8xf32> to vector<8xf32>
    %29 = vector.shape_cast %28 : vector<8xf32> to vector<8x1xf32>
    %30 = tpu.reciprocal %29 {approx = true} : vector<8x1xf32> -> vector<8x1xf32>
    %31 = vector.broadcast %30 : vector<8x1xf32> to vector<8x8xf32>
    %32 = arith.mulf %27, %31 : vector<8x8xf32>
    %33 = arith.truncf %32 : vector<8x8xf32> to vector<8x8xbf16>
    %cst_14 = arith.constant dense<0.000000e+00> : vector<8x8xf32>
    %34 = tpu.matmul %33, %17, %cst_14 {dimension_numbers = #tpu.dot_dimension_numbers<[1], [0], [0], [1], [0, 0, 1, 1], [], []>} : vector<8x8xbf16>, vector<8x8xbf16>, vector<8x8xf32> -> vector<8x8xf32>
    %35 = arith.truncf %34 : vector<8x8xf32> to vector<8x8xbf16>
    %c0_15 = arith.constant 0 : index
    %c0_16 = arith.constant 0 : index
    %36 = vector.load %arg8[%c0_15, %c0_16] : memref<8x32xbf16, #tpu.memory_space<vmem>>, vector<8x8xbf16>
    tpu.vector_store %arg8[%c0_15, %c0_16], %35 {strides = array<i32>} : memref<8x32xbf16, #tpu.memory_space<vmem>>, vector<8x8xbf16>,
    %37 = vector.extract_strided_slice %9 {offsets = [0, 8], sizes = [8, 8], strides = [1, 1]} : vector<8x32xf32> to vector<8x8xf32>
    %38 = arith.truncf %37 : vector<8x8xf32> to vector<8x8xbf16>
    %39 = vector.extract_strided_slice %10 {offsets = [0, 8], sizes = [8, 8], strides = [1, 1]} : vector<8x32xf32> to vector<8x8xf32>
    %40 = arith.truncf %39 : vector<8x8xf32> to vector<8x8xbf16>
    %41 = vector.extract_strided_slice %11 {offsets = [0, 8], sizes = [8, 8], strides = [1, 1]} : vector<8x32xf32> to vector<8x8xf32>
    %42 = arith.truncf %41 : vector<8x8xf32> to vector<8x8xbf16>
    %cst_17 = arith.constant dense<0.000000e+00> : vector<8x8xf32>
    %43 = tpu.matmul %38, %40, %cst_17 {dimension_numbers = #tpu.dot_dimension_numbers<[1], [1], [0], [0], [0, 0, 1, 0], [], []>} : vector<8x8xbf16>, vector<8x8xbf16>, vector<8x8xf32> -> vector<8x8xf32>
    %cst_18 = arith.constant 0.000000e+00 : f32
    %44 = vector.broadcast %cst_18 : f32 to vector<8x8xf32>
    %45 = arith.cmpf oeq, %8, %44 : vector<8x8xf32>
    %cst_19 = arith.constant -1.000000e+09 : f32
    %46 = vector.broadcast %cst_19 : f32 to vector<8x8xf32>
    %47 = arith.select %45, %46, %43 : vector<8x8xi1>, vector<8x8xf32>
    %cst_20 = arith.constant dense<0xFF800000> : vector<8xf32>
    %48 = vector.multi_reduction <maximumf>, %47, %cst_20 [1] : vector<8x8xf32> to vector<8xf32>
    %49 = vector.shape_cast %48 : vector<8xf32> to vector<8x1xf32>
    %50 = vector.broadcast %49 : vector<8x1xf32> to vector<8x8xf32>
    %51 = arith.subf %47, %50 : vector<8x8xf32>
    %52 = math.exp %51 : vector<8x8xf32>
    %cst_21 = arith.constant dense<0.000000e+00> : vector<8xf32>
    %53 = vector.multi_reduction <add>, %52, %cst_21 [1] : vector<8x8xf32> to vector<8xf32>
    %54 = vector.shape_cast %53 : vector<8xf32> to vector<8x1xf32>
    %55 = tpu.reciprocal %54 {approx = true} : vector<8x1xf32> -> vector<8x1xf32>
    %56 = vector.broadcast %55 : vector<8x1xf32> to vector<8x8xf32>
    %57 = arith.mulf %52, %56 : vector<8x8xf32>
    %58 = arith.truncf %57 : vector<8x8xf32> to vector<8x8xbf16>
    %cst_22 = arith.constant dense<0.000000e+00> : vector<8x8xf32>
    %59 = tpu.matmul %58, %42, %cst_22 {dimension_numbers = #tpu.dot_dimension_numbers<[1], [0], [0], [1], [0, 0, 1, 1], [], []>} : vector<8x8xbf16>, vector<8x8xbf16>, vector<8x8xf32> -> vector<8x8xf32>
    %60 = arith.truncf %59 : vector<8x8xf32> to vector<8x8xbf16>
    %c0_23 = arith.constant 0 : index
    %c8 = arith.constant 8 : index
    %61 = vector.load %arg8[%c0_23, %c8] : memref<8x32xbf16, #tpu.memory_space<vmem>>, vector<8x8xbf16>
    tpu.vector_store %arg8[%c0_23, %c8], %60 {strides = array<i32>} : memref<8x32xbf16, #tpu.memory_space<vmem>>, vector<8x8xbf16>,
    %62 = vector.extract_strided_slice %9 {offsets = [0, 16], sizes = [8, 8], strides = [1, 1]} : vector<8x32xf32> to vector<8x8xf32>
    %63 = arith.truncf %62 : vector<8x8xf32> to vector<8x8xbf16>
    %64 = vector.extract_strided_slice %10 {offsets = [0, 16], sizes = [8, 8], strides = [1, 1]} : vector<8x32xf32> to vector<8x8xf32>
    %65 = arith.truncf %64 : vector<8x8xf32> to vector<8x8xbf16>
    %66 = vector.extract_strided_slice %11 {offsets = [0, 16], sizes = [8, 8], strides = [1, 1]} : vector<8x32xf32> to vector<8x8xf32>
    %67 = arith.truncf %66 : vector<8x8xf32> to vector<8x8xbf16>
    %cst_24 = arith.constant dense<0.000000e+00> : vector<8x8xf32>
    %68 = tpu.matmul %63, %65, %cst_24 {dimension_numbers = #tpu.dot_dimension_numbers<[1], [1], [0], [0], [0, 0, 1, 0], [], []>} : vector<8x8xbf16>, vector<8x8xbf16>, vector<8x8xf32> -> vector<8x8xf32>
    %cst_25 = arith.constant 0.000000e+00 : f32
    %69 = vector.broadcast %cst_25 : f32 to vector<8x8xf32>
    %70 = arith.cmpf oeq, %8, %69 : vector<8x8xf32>
    %cst_26 = arith.constant -1.000000e+09 : f32
    %71 = vector.broadcast %cst_26 : f32 to vector<8x8xf32>
    %72 = arith.select %70, %71, %68 : vector<8x8xi1>, vector<8x8xf32>
    %cst_27 = arith.constant dense<0xFF800000> : vector<8xf32>
    %73 = vector.multi_reduction <maximumf>, %72, %cst_27 [1] : vector<8x8xf32> to vector<8xf32>
    %74 = vector.shape_cast %73 : vector<8xf32> to vector<8x1xf32>
    %75 = vector.broadcast %74 : vector<8x1xf32> to vector<8x8xf32>
    %76 = arith.subf %72, %75 : vector<8x8xf32>
    %77 = math.exp %76 : vector<8x8xf32>
    %cst_28 = arith.constant dense<0.000000e+00> : vector<8xf32>
    %78 = vector.multi_reduction <add>, %77, %cst_28 [1] : vector<8x8xf32> to vector<8xf32>
    %79 = vector.shape_cast %78 : vector<8xf32> to vector<8x1xf32>
    %80 = tpu.reciprocal %79 {approx = true} : vector<8x1xf32> -> vector<8x1xf32>
    %81 = vector.broadcast %80 : vector<8x1xf32> to vector<8x8xf32>
    %82 = arith.mulf %77, %81 : vector<8x8xf32>
    %83 = arith.truncf %82 : vector<8x8xf32> to vector<8x8xbf16>
    %cst_29 = arith.constant dense<0.000000e+00> : vector<8x8xf32>
    %84 = tpu.matmul %83, %67, %cst_29 {dimension_numbers = #tpu.dot_dimension_numbers<[1], [0], [0], [1], [0, 0, 1, 1], [], []>} : vector<8x8xbf16>, vector<8x8xbf16>, vector<8x8xf32> -> vector<8x8xf32>
    %85 = arith.truncf %84 : vector<8x8xf32> to vector<8x8xbf16>
    %c0_30 = arith.constant 0 : index
    %c16 = arith.constant 16 : index
    %86 = vector.load %arg8[%c0_30, %c16] : memref<8x32xbf16, #tpu.memory_space<vmem>>, vector<8x8xbf16>
    tpu.vector_store %arg8[%c0_30, %c16], %85 {strides = array<i32>} : memref<8x32xbf16, #tpu.memory_space<vmem>>, vector<8x8xbf16>,
    %87 = vector.extract_strided_slice %9 {offsets = [0, 24], sizes = [8, 8], strides = [1, 1]} : vector<8x32xf32> to vector<8x8xf32>
    %88 = arith.truncf %87 : vector<8x8xf32> to vector<8x8xbf16>
    %89 = vector.extract_strided_slice %10 {offsets = [0, 24], sizes = [8, 8], strides = [1, 1]} : vector<8x32xf32> to vector<8x8xf32>
    %90 = arith.truncf %89 : vector<8x8xf32> to vector<8x8xbf16>
    %91 = vector.extract_strided_slice %11 {offsets = [0, 24], sizes = [8, 8], strides = [1, 1]} : vector<8x32xf32> to vector<8x8xf32>
    %92 = arith.truncf %91 : vector<8x8xf32> to vector<8x8xbf16>
    %cst_31 = arith.constant dense<0.000000e+00> : vector<8x8xf32>
    %93 = tpu.matmul %88, %90, %cst_31 {dimension_numbers = #tpu.dot_dimension_numbers<[1], [1], [0], [0], [0, 0, 1, 0], [], []>} : vector<8x8xbf16>, vector<8x8xbf16>, vector<8x8xf32> -> vector<8x8xf32>
    %cst_32 = arith.constant 0.000000e+00 : f32
    %94 = vector.broadcast %cst_32 : f32 to vector<8x8xf32>
    %95 = arith.cmpf oeq, %8, %94 : vector<8x8xf32>
    %cst_33 = arith.constant -1.000000e+09 : f32
    %96 = vector.broadcast %cst_33 : f32 to vector<8x8xf32>
    %97 = arith.select %95, %96, %93 : vector<8x8xi1>, vector<8x8xf32>
    %cst_34 = arith.constant dense<0xFF800000> : vector<8xf32>
    %98 = vector.multi_reduction <maximumf>, %97, %cst_34 [1] : vector<8x8xf32> to vector<8xf32>
    %99 = vector.shape_cast %98 : vector<8xf32> to vector<8x1xf32>
    %100 = vector.broadcast %99 : vector<8x1xf32> to vector<8x8xf32>
    %101 = arith.subf %97, %100 : vector<8x8xf32>
    %102 = math.exp %101 : vector<8x8xf32>
    %cst_35 = arith.constant dense<0.000000e+00> : vector<8xf32>
    %103 = vector.multi_reduction <add>, %102, %cst_35 [1] : vector<8x8xf32> to vector<8xf32>
    %104 = vector.shape_cast %103 : vector<8xf32> to vector<8x1xf32>
    %105 = tpu.reciprocal %104 {approx = true} : vector<8x1xf32> -> vector<8x1xf32>
    %106 = vector.broadcast %105 : vector<8x1xf32> to vector<8x8xf32>
    %107 = arith.mulf %102, %106 : vector<8x8xf32>
    %108 = arith.truncf %107 : vector<8x8xf32> to vector<8x8xbf16>
    %cst_36 = arith.constant dense<0.000000e+00> : vector<8x8xf32>
    %109 = tpu.matmul %108, %92, %cst_36 {dimension_numbers = #tpu.dot_dimension_numbers<[1], [0], [0], [1], [0, 0, 1, 1], [], []>} : vector<8x8xbf16>, vector<8x8xbf16>, vector<8x8xf32> -> vector<8x8xf32>
    %110 = arith.truncf %109 : vector<8x8xf32> to vector<8x8xbf16>
    %c0_37 = arith.constant 0 : index
    %c24 = arith.constant 24 : index
    %111 = vector.load %arg8[%c0_37, %c24] : memref<8x32xbf16, #tpu.memory_space<vmem>>, vector<8x8xbf16>
    tpu.vector_store %arg8[%c0_37, %c24], %110 {strides = array<i32>} : memref<8x32xbf16, #tpu.memory_space<vmem>>, vector<8x8xbf16>,
    %c0_38 = arith.constant 0 : index
    %c0_39 = arith.constant 0 : index
    %112 = vector.load %arg8[%c0_38, %c0_39] : memref<8x32xbf16, #tpu.memory_space<vmem>>, vector<8x32xbf16>
    %c0_40 = arith.constant 0 : index
    %c0_41 = arith.constant 0 : index
    %113 = vector.load %arg5[%c0_40, %c0_41] : memref<32x32xbf16, #tpu.memory_space<vmem>>, vector<32x32xbf16>
    %cst_42 = arith.constant dense<0.000000e+00> : vector<8x32xf32>
    %114 = tpu.matmul %112, %113, %cst_42 {dimension_numbers = #tpu.dot_dimension_numbers<[1], [0], [0], [1], [0, 0, 1, 1], [], []>} : vector<8x32xbf16>, vector<32x32xbf16>, vector<8x32xf32> -> vector<8x32xf32>
    %c0_43 = arith.constant 0 : index
    %c0_44 = arith.constant 0 : index
    %115 = vector.load %arg6[%c0_43, %c0_44] : memref<1x32xf32, #tpu.memory_space<vmem>>, vector<1x32xf32>
    %116 = vector.broadcast %115 : vector<1x32xf32> to vector<8x32xf32>
    %117 = arith.addf %114, %116 : vector<8x32xf32>
    %c0_45 = arith.constant 0 : index
    %c0_46 = arith.constant 0 : index
    %c0_47 = arith.constant 0 : index
    %118 = vector.load %arg7[%c0_45, %c0_46, %c0_47] : memref<1x8x32xf32, #tpu.memory_space<vmem>>, vector<1x8x32xf32>
    %119 = vector.shape_cast %118 : vector<1x8x32xf32> to vector<8x32xf32>
    %120 = vector.shape_cast %117 : vector<8x32xf32> to vector<1x8x32xf32>
    tpu.vector_store %arg7[%c0_45, %c0_46, %c0_47], %120 {strides = array<i32>} : memref<1x8x32xf32, #tpu.memory_space<vmem>>, vector<1x8x32xf32>,
    return
  }
  func.func @transform_0(%arg0: i32) -> (i32, i32, i32) {
    %c0_i32 = arith.constant 0 : i32
    %c0_i32_0 = arith.constant 0 : i32
    %c0_i32_1 = arith.constant 0 : i32
    return %arg0, %c0_i32, %c0_i32_0 : i32, i32, i32
  }
  func.func @transform_1(%arg0: i32) -> (i32, i32, i32) {
    %c0_i32 = arith.constant 0 : i32
    %c0_i32_0 = arith.constant 0 : i32
    %c0_i32_1 = arith.constant 0 : i32
    return %arg0, %c0_i32, %c0_i32_0 : i32, i32, i32
  }
  func.func @transform_2(%arg0: i32) -> (i32, i32) {
    %c0_i32 = arith.constant 0 : i32
    %c0_i32_0 = arith.constant 0 : i32
    %c0_i32_1 = arith.constant 0 : i32
    return %c0_i32, %c0_i32_0 : i32, i32
  }
  func.func @transform_3(%arg0: i32) -> (i32, i32) {
    %c0_i32 = arith.constant 0 : i32
    %c0_i32_0 = arith.constant 0 : i32
    %c0_i32_1 = arith.constant 0 : i32
    return %c0_i32, %c0_i32_0 : i32, i32
  }
  func.func @transform_4(%arg0: i32) -> (i32, i32) {
    %c0_i32 = arith.constant 0 : i32
    %c0_i32_0 = arith.constant 0 : i32
    %c0_i32_1 = arith.constant 0 : i32
    return %c0_i32, %c0_i32_0 : i32, i32
  }
  func.func @transform_5(%arg0: i32) -> (i32, i32) {
    %c0_i32 = arith.constant 0 : i32
    %c0_i32_0 = arith.constant 0 : i32
    %c0_i32_1 = arith.constant 0 : i32
    return %c0_i32, %c0_i32_0 : i32, i32
  }
  func.func @transform_6(%arg0: i32) -> (i32, i32, i32) {
    %c0_i32 = arith.constant 0 : i32
    %c0_i32_0 = arith.constant 0 : i32
    %c0_i32_1 = arith.constant 0 : i32
    return %arg0, %c0_i32, %c0_i32_0 : i32, i32, i32
  }
}

</mosaic_0001>

<bundles_post_ra>
// kernel: _lambda_.1
= control target key start
LH: loop header
LB: loop body
LE: loop exit
PB: predicated region body
PF: predicated region fallthrough
CT: control target
= control target key end

     0   :  { %11 = vsyncpa [#allocation4], 0  ;;  %s1064_s0 = inlined_call_operand.vmem [shape: bf16[2,8,32], index: 0, kind: input, shape index: {}]   ;;  %s1065_s1 = inlined_call_operand.vmem [shape: f32[2,8,8], index: 1, kind: input, shape index: {}]   ;;  %s1066_s2 = inlined_call_operand.vmem [shape: bf16[32,96], index: 2, kind: input, shape index: {}]   ;;  %s1067_s3 = inlined_call_operand.vmem [shape: f32[1,96], index: 3, kind: input, shape index: {}]   ;;  %s1068_s4 = inlined_call_operand.vmem [shape: bf16[32,32], index: 4, kind: input, shape index: {}]   ;;  %s1069_s5 = inlined_call_operand.vmem [shape: f32[1,32], index: 5, kind: input, shape index: {}]   ;;  %s1070_s6 = inlined_call_operand.hbm [shape: f32[2,8,32], index: 6, kind: output, shape index: {}]  }
   0x1   :  { %13 = vsyncpa [#allocation4 + $0x1], 0  ;;  %s909_s21 = smov 0   ;;  %s911_s22 = smov 0  }
   0x2   :  { %s913_s23 = smov 0   ;;  %s915_s24 = smov 0  }
   0x3 LB: > { %s930_s25 = sadd.s32 4294967295, %s858_s24   ;;  %s684_s26 = sadd.s32 4294967294, %s858_s24   ;;  %s858_s24 = sphi %s915_s24, %s1076_s24   ;;  %s854_s23 = sphi %s913_s23, %s1075_s23   ;;  %s850_s22 = sphi %s911_s22, %s1074_s22   ;;  %s846_s21 = sphi %s909_s21, %s1073_s21  }
   0x4   : > { %s934_s27 = sadd.s32 1, %s858_s24   ;;  %s162_s28 = sadd.s32 1, %s854_s23 }
   0x5   : > { %s159_s29 = ssub.s32 %s858_s24, %s934_s27  ;;  %p172_p0 = scmp.ne.s32.totalorder %s854_s23, %s850_s22 }
   0x6   : > { %p160_p1 = scmp.eq.s32.totalorder %s159_s29, 0  ;;  %p173_p2 = scmp.eq.s32.totalorder %s930_s25, 1 }
   0x7   : > { %p178_p3 = scmp.ne.s32.totalorder %s850_s22, %s846_s21  ;;  %p179_p4 = scmp.eq.s32.totalorder %s684_s26, 1 }
   0x8   : > { %s945_s30 = scalar_select %p160_p1, %s854_s23, %s162_s28  }
   0x9   : > { %p947_p5 = por %p173_p2, %p172_p0  ;;  %p951_p6 = por %p179_p4, %p178_p3 }
   0xa   : > { %p687_p7 = scmp.ge.s32.totalorder %s858_s24, 1  ;;  %p223_p8 = scmp.lt.s32.totalorder %s858_s24, 3 }
   0xc   : > { %p224_p9 = pnand %p687_p7, %p223_p8 }
   0xd   : > { %p256_p10 = scmp.lt.s32.totalorder (!%p224_p9), %s930_s25, 1  ;;  %s860_s20 = smov (!%p224_p9), 104  }
   0xe   : > { %227 = sbr.rel (%p224_p9) target bundleno = 1101 (0x44d), region = 44  ;;  %s861_s26 = smov (!%p224_p9), 120  }
   0xf   : > { %s862_s28 = smov (!%p224_p9), 96   ;;  %s863_s29 = smov (!%p224_p9), 80  }
  0x10   : > { %s864_s9 = smov (!%p224_p9), 72   ;;  %s865_s10 = smov (!%p224_p9), 88  }
  0x11   : > { %s866_s11 = smov (!%p224_p9), 112   ;;  %s869_s18 = smov (!%p224_p9), 56  }
  0x12   : > { %s870_s19 = smov (!%p224_p9), 48  }
  0x13   : > { %v722_v0 = vld [vmem:[%s1066_s2 + $0x8] sm:$0xff]  ;;  %v721_v1 = vld [vmem:[%s1066_s2] sm:$0xff]  ;;  %s965_s13 = scalar_select %p256_p10, %s930_s25, 1  ;;  %vm286_vm0 = vcmask 261120   ;;  %vm308_vm1 = vcmask 64512   ;;  %vm347_vm3 = vcmask 1043456  }
  0x14   : > { %296 = vmatpush.bf16.msra.mxu0 %v722_v0  ;;  %v778_v3 = vld [vmem:[%s1067_s3] ss:$0 sm:$0xff]  ;;  %vm365_vm4 = vcmask 60416   ;;  %vm429_vm5 = vcmask 126016   ;;  %vm493_vm6 = vcmask 191616   ;;  %vm557_vm7 = vcmask 257216  }
  0x15   : > { %s689_s14 = sshll.u32 %s965_s13, 2  ;;  %s690_s12 = sshll.u32 %s965_s13, 3 }
  0x16   : > { %s259_s17 = scalar_lea.vmem %s1064_s0, %s689_s14  ;;  %s263_s16 = scalar_lea.vmem %s1065_s1, %s690_s12 }
  0x17   : > { %v265_v2 = vld [vmem:[%s259_s17] sm:$0xf]  ;;  %s867_s13 = smov 64   ;;  %s868_s17 = smov 40  }
  0x18   : > { %297 = vmatpush.bf16.msra.mxu0 %v721_v1  ;;  %v303_v19 = vld [vmem:[%s263_s16] sm:$0xff]  ;;  %s253_s12 = sand.u32 1, %s850_s22   ;;  %s718_s14 = sshll.u32 %s930_s25, 3 }
  0x19   : > { %vm328_vm2 = vcmp.eq.f32.partialorder %v303_v19, 0.0  ;;  %s688_s15 = sshll.u32 %s253_s12, 3  ;;  %s598_s25 = scalar_lea.sflag [#allocation4], %s253_s12 }
  0x1b   : > { %699 = vmatmul.msk.bf16.vlgmr.msra.gmra.mxu0 %vm286_vm0, %v265_v2 }
  0x98   : > { %v299_v4 = vpop.f32.mrf.mxu0 }
  0x99   : > { %v300_v5 = vadd.f32 %v778_v3, %v299_v4 }
  0x9b   : > { %v975_v6 = vpack.c.bf16 %v300_v5, %v300_v5 }
  0x9d   : > { %495 = vrot.lane.b32.xlu2 %v975_v6, %s860_s20  ;;  %367 = vrot.lane.b32.xlu1 %v975_v6, %s861_s26  ;;  %s871_s20 = smov 8   ;;  %s872_s26 = smov 16  }
  0x9e   : > { %306 = vrot.lane.b32.xlu0 %v975_v6, %s862_s28  ;;  %s873_s28 = smov 24  }
  0xa0   : > { %v301_v7 = vpop.f32.mrf.mxu0 }
  0xa5   : > { %433 = vrot.lane.b32.xlu2 %v975_v6, %s863_s29  ;;  %497 = vrot.lane.b32.xlu1 %v975_v6, %s864_s9 }
  0xa6   : > { %369 = vrot.lane.b32.xlu0 %v975_v6, %s865_s10 }
  0xae   : > { %431 = vrot.lane.b32.xlu0 %v975_v6, %s866_s11 }
  0xf7   : > { %v496_v8 = vpop.permute.xlu2 %495 }
  0xff   : > { %v434_v9 = vpop.permute.xlu2 %433 }
 0x100   : > { %v439_v10 = vsel %vm308_vm1, %v434_v9, 0 }
 0x101   : > { %448 = vmatpush.bf16.xpose.msrb.mxu0 %v439_v10 }
 0x10f   : > { %v368_v11 = vpop.permute.xlu1 %367 }
 0x110   : > { %v307_v12 = vpop.permute.xlu0 %306 }
 0x111   : > { %v313_v13 = vsel %vm308_vm1, %v307_v12, 0 }
 0x112   : > { %322 = vmatpush.bf16.xpose.msra.mxu1 %v313_v13 }
 0x117   : > { %v498_v14 = vpop.permute.xlu1 %497 }
 0x118   : > { %v370_v15 = vpop.permute.xlu0 %369  ;;  %v503_v16 = vsel %vm308_vm1, %v498_v14, 0 }
 0x119   : > { %700 = vmatmul.msk.bf16.vlgmr.msra.gmra.mxu1 %vm308_vm1, %v975_v6  ;;  %v375_v17 = vsel %vm308_vm1, %v370_v15, 0 }
 0x11a   : > { %384 = vmatpush.bf16.xpose.msra.mxu3 %v375_v17 }
 0x120   : > { %v432_v18 = vpop.permute.xlu0 %431 }
 0x121   : > { %702 = vmatmul.msk.bf16.vlgmr.msra.gmra.mxu3 %vm308_vm1, %v368_v11  ;;  %704 = vmatmul.msk.bf16.vlgmr.msrb.gmra.mxu0 %vm308_vm1, %v432_v18 }
 0x122   : > { %512 = vmatpush.bf16.xpose.msrb.mxu3 %v503_v16 }
 0x131   : > { %706 = vmatmul.msk.bf16.vlgmr.msrb.gmra.mxu3 %vm308_vm1, %v496_v8 }
 0x196   : > { %v324_v20 = vpop.f32.mrf.mxu1 }
 0x197   : > { %v329_v21 = vsel %vm328_vm2, -1e+09, %v324_v20 }
 0x198   : > { %v330_v22 = vsel %vm308_vm1, %v329_v21, -inf }
 0x199   : > { %331 = vmax.xlane.f32.xlu1 %v330_v22 }
 0x19e   : > { %v326_v23 = vpop.f32.mrf.mxu1  ;;  %v450_v24 = vpop.f32.mrf.mxu0 }
 0x19f   : > { %v454_v29 = vsel %vm328_vm2, -1e+09, %v450_v24 }
 0x1a0   : > { %v455_v31 = vsel %vm308_vm1, %v454_v29, -inf }
 0x1a4   : > { %v386_v25 = vpop.f32.mrf.mxu3 }
 0x1a5   : > { %v390_v26 = vsel %vm328_vm2, -1e+09, %v386_v25 }
 0x1a6   : > { %v452_v27 = vpop.f32.mrf.mxu0  ;;  %v391_v28 = vsel %vm308_vm1, %v390_v26, -inf }
 0x1a7   : > { %392 = vmax.xlane.f32.xlu2 %v391_v28  ;;  %v724_v28 = vld [vmem:[%s1068_s4 + $0x8] sm:$0xff] }
 0x1a8   : > { %589 = vmatpush.bf16.msra.mxu0 %v724_v28 }
 0x1ac   : > { %v388_v30 = vpop.f32.mrf.mxu3 }
 0x1af   : > { %456 = vmax.xlane.f32.xlu2 %v455_v31 }
 0x1b4   : > { %v514_v32 = vpop.f32.mrf.mxu3 }
 0x1b5   : > { %v518_v33 = vsel %vm328_vm2, -1e+09, %v514_v32 }
 0x1b6   : > { %v519_v34 = vsel %vm308_vm1, %v518_v33, -inf }
 0x1b7   : > { %520 = vmax.xlane.f32.xlu0 %v519_v34  ;;  %v779_v34 = vld [vmem:[%s1069_s5] ss:$0 sm:$0xff] }
 0x1bc   : > { %v516_v35 = vpop.f32.mrf.mxu3 }
 0x1c7   : > { %342 = vrot.lane.b32.xlu2 %v975_v6, %s867_s13 }
 0x1cf   : > { %531 = vrot.lane.b32.xlu2 %v975_v6, %s868_s17  ;;  %s608_s17 = scalar_lea.hbm %s1070_s6, %s718_s14  ;;  %s816_s14 = scalar_lea.hbm %s1070_s6, 16 }
 0x20c   : > { %v332_v36 = vpop.xlane.xlu1 %331 }
 0x20d   : > { %v333_v37 = vsub.f32 %v329_v21, %v332_v36 }
 0x20f   : > { %v334_v38 = vmul.f32 1.442695, %v333_v37 }
 0x211   : > { %780 = vpow2.f32 %v334_v38 }
 0x217   : > { %v781_v39 = vpop.eup %780 }
 0x218   : > { %v336_v40 = vsel %vm308_vm1, %v781_v39, 0.0 }
 0x219   : > { %337 = vadd.xlane.f32.xlu1 %v336_v40 }
 0x21a   : > { %v393_v41 = vpop.xlane.xlu2 %392 }
 0x21b   : > { %v394_v44 = vsub.f32 %v390_v26, %v393_v41 }
 0x21d   : > { %v395_v46 = vmul.f32 1.442695, %v394_v44 }
 0x222   : > { %v457_v42 = vpop.xlane.xlu2 %456 }
 0x223   : > { %v458_v43 = vsub.f32 %v454_v29, %v457_v42  ;;  %v723_v29 = vld [vmem:[%s1068_s4] sm:$0xff] }
 0x224   : > { %590 = vmatpush.bf16.msra.mxu0 %v723_v29 }
 0x225   : > { %v459_v45 = vmul.f32 1.442695, %v458_v43 }
 0x227   : > { %782 = vpow2.f32 %v459_v45 }
 0x228   : > { %784 = vpow2.f32 %v395_v46 }
 0x22a   : > { %v343_v47 = vpop.permute.xlu2 %342  ;;  %v521_v48 = vpop.xlane.xlu0 %520 }
 0x22b   : > { %v349_v49 = vsel %vm347_vm3, %v343_v47, 0  ;;  %v522_v51 = vsub.f32 %v518_v33, %v521_v48 }
 0x22c   : > { %358 = vmatpush.bf16.msra.mxu2 %v349_v49 }
 0x22d   : > { %v783_v50 = vpop.eup %782  ;;  %v523_v53 = vmul.f32 1.442695, %v522_v51 }
 0x22e   : > { %v461_v52 = vsel %vm308_vm1, %v783_v50, 0.0  ;;  %v785_v54 = vpop.eup %784 }
 0x22f   : > { %462 = vadd.xlane.f32.xlu0 %v461_v52  ;;  %786 = vpow2.f32 %v523_v53  ;;  %v397_v55 = vsel %vm308_vm1, %v785_v54, 0.0 }
 0x232   : > { %403 = vrot.lane.b32.xlu1 %v975_v6, %s869_s18  ;;  %v532_v63 = vpop.permute.xlu2 %531 }
 0x233   : > { %v537_v2 = vsel %vm347_vm3, %v532_v63, 0 }
 0x235   : > { %v787_v56 = vpop.eup %786 }
 0x236   : > { %v525_v57 = vsel %vm308_vm1, %v787_v56, 0.0 }
 0x237   : > { %398 = vadd.xlane.f32.xlu0 %v397_v55 }
 0x23f   : > { %526 = vadd.xlane.f32.xlu0 %v525_v57 }
 0x253   : > { %467 = vrot.lane.b32.xlu0 %v975_v6, %s870_s19 }
 0x28c   : > { %v338_v58 = vpop.xlane.xlu1 %337 }
 0x28d   : > { %788 = vrcp.f32 %v338_v58 }
 0x293   : > { %v789_v59 = vpop.eup %788 }
 0x294   : > { %v340_v60 = vmul.f32 %v789_v59, %v781_v39 }
 0x296   : > { %v341_v61 = vpack.c.bf16 %v340_v60, %v340_v60 }
 0x298   : > { %701 = vmatmul.msk.bf16.vlgmr.msra.gmra.mxu2 %vm308_vm1, %v341_v61 }
 0x2a2   : > { %v463_v62 = vpop.xlane.xlu0 %462 }
 0x2a4   : > { %v404_v0 = vpop.permute.xlu1 %403 }
 0x2a5   : > { %v409_v1 = vsel %vm347_vm3, %v404_v0, 0 }
 0x2a6   : > { %418 = vmatpush.bf16.msrb.mxu2 %v409_v1 }
 0x2aa   : > { %546 = vmatpush.bf16.msra.mxu2 %v537_v2  ;;  %v399_v3 = vpop.xlane.xlu0 %398 }
 0x2ab   : > { %790 = vrcp.f32 %v399_v3 }
 0x2b1   : > { %v791_v4 = vpop.eup %790 }
 0x2b2   : > { %v401_v5 = vmul.f32 %v791_v4, %v785_v54  ;;  %v527_v6 = vpop.xlane.xlu0 %526 }
 0x2b3   : > { %792 = vrcp.f32 %v527_v6 }
 0x2b4   : > { %v402_v7 = vpack.c.bf16 %v401_v5, %v401_v5  ;;  %794 = vrcp.f32 %v463_v62 }
 0x2b6   : > { %703 = vmatmul.msk.bf16.vlgmr.msrb.gmra.mxu2 %vm308_vm1, %v402_v7 }
 0x2b9   : > { %v793_v8 = vpop.eup %792 }
 0x2ba   : > { %v529_v9 = vmul.f32 %v793_v8, %v787_v56  ;;  %v795_v10 = vpop.eup %794 }
 0x2bb   : > { %v465_v11 = vmul.f32 %v795_v10, %v783_v50 }
 0x2bc   : > { %v530_v12 = vpack.c.bf16 %v529_v9, %v529_v9 }
 0x2bd   : > { %v466_v15 = vpack.c.bf16 %v465_v11, %v465_v11 }
 0x2c5   : > { %v468_v13 = vpop.permute.xlu0 %467 }
 0x2c6   : > { %707 = vmatmul.msk.bf16.vlgmr.msra.gmra.mxu2 %vm308_vm1, %v530_v12  ;;  %v473_v14 = vsel %vm347_vm3, %v468_v13, 0 }
 0x2c7   : > { %482 = vmatpush.bf16.msrb.mxu1 %v473_v14 }
 0x2ca   : > { %705 = vmatmul.msk.bf16.vlgmr.msrb.gmra.mxu1 %vm308_vm1, %v466_v15 }
 0x31b   : > { %v360_v16 = vpop.f32.mrf.mxu2 }
 0x31c   : > { %v364_v17 = vpack.c.bf16 %v360_v16, %v360_v16 }
 0x31e   : > { %366 = vst.msk [vmem:[#allocation2] sm:$0xf] %vm365_vm4, %v364_v17 }
 0x323   : > { %v362_v18 = vpop.f32.mrf.mxu2 }
 0x339   : > { %v420_v19 = vpop.f32.mrf.mxu2 }
 0x33a   : > { %v424_v20 = vpack.c.bf16 %v420_v19, %v420_v19 }
 0x33c   : > { %426 = vrot.lane.b32.xlu1 %v424_v20, %s871_s20  ;;  %s255_s20 = scalar_lea.vmem [#allocation3], %s688_s15 }
 0x341   : > { %v422_v21 = vpop.f32.mrf.mxu2 }
 0x347   : > { %v484_v22 = vpop.f32.mrf.mxu1 }
 0x348   : > { %v488_v23 = vpack.c.bf16 %v484_v22, %v484_v22 }
 0x349   : > { %v548_v24 = vpop.f32.mrf.mxu2 }
 0x34a   : > { %v552_v25 = vpack.c.bf16 %v548_v24, %v548_v24  ;;  %490 = vrot.lane.b32.xlu2 %v488_v23, %s872_s26  ;;  %s610_s26 = sshll.u32 %s255_s20, 4  ;;  %s611_s26 = int_to_ptr.vmem [resolvable:$true] %s610_s26 }
 0x34c   : > { %554 = vrot.lane.b32.xlu1 %v552_v25, %s873_s28  ;;  %s612_s28 = sshll.u32 %s608_s17, 4  ;;  %s613_s28 = int_to_ptr.hbm [resolvable:$true] %s612_s28 }
 0x34d   : > { %s810_s29 = sshra.s32 %s613_s28, 4  ;;  %s811_s29 = int_to_ptr.hbm [resolvable:$true] %s810_s29 }
 0x34e   : > { %s812_s9 = scalar_lea.hbm %s811_s29, 8  ;;  %p817_p0 = scmp.lt.s32.totalorder %s811_s29, %s1070_s6 }
 0x34f   : > { %v486_v26 = vpop.f32.mrf.mxu1  ;;  %p813_p11 = scmp.ne.s32.totalorder %s811_s29, %s812_s9  ;;  %p818_p1 = scmp.lt.s32.totalorder %s816_s14, %s812_s9 }
 0x351   : > { %v550_v27 = vpop.f32.mrf.mxu2  ;;  %p814_p12 = pnand %p813_p11, %p947_p5  ;;  %p819_p2 = por %p818_p1, %p817_p0 }
 0x353   : > { %p815_p13 = pneg %p814_p12 }
 0x355   : > { %p820_p3 = pnand %p819_p2, %p815_p13 }
 0x3a4   : > { %v491_v31 = vpop.permute.xlu2 %490 }
 0x3ae   : > { %v427_v30 = vpop.permute.xlu1 %426 }
 0x3af   : > { %430 = vst.msk [vmem:[#allocation2] sm:$0xf] %vm429_vm5, %v427_v30 }
 0x3b0   : > { %494 = vst.msk [vmem:[#allocation2] sm:$0xf] %vm493_vm6, %v491_v31 }
 0x3be   : > { %v555_v32 = vpop.permute.xlu1 %554 }
 0x3bf   : > { %558 = vst.msk [vmem:[#allocation2] sm:$0xf] %vm557_vm7, %v555_v32 }
 0x3c6   : > { %v559_v33 = vld [vmem:[#allocation2] sm:$0xf] }
 0x3c7   : > { %716 = vmatmul.msk.bf16.vlgmr.msra.gmra.mxu0 %vm286_vm0, %v559_v33 }
 0x444   : > { %v592_v35 = vpop.f32.mrf.mxu0 }
 0x445   : > { %v593_v36 = vadd.f32 %v779_v34, %v592_v35 }
 0x447   : > { %596 = vst.msk [vmem:[%s255_s20] sm:$0xff] %vm286_vm0, %v593_v36 }
 0x448   : > { %823 = shalt.err (!%p820_p3)
}
 0x449   : > { %725 = dma.vmem_to_hbm [thread:$0]  (%p947_p5), %s611_s26, 128, %s613_s28, %s598_s25  }
 0x44c   : > { %v594_v37 = vpop.f32.mrf.mxu0 }
 0x44d PF: > { %p731_p4 = scmp.ge.s32.totalorder %s858_s24, 2  ;;  %s624_s12 = sand.u32 1, %s846_s21  }
 0x44e   : > { %s625_s13 = scalar_lea.sflag [#allocation4], %s624_s12 }
 0x44f   : > { %p728_p7 = pnand %p731_p4, %p951_p6 }
 0x451   : > { %p729_p8 = pneg %p728_p7 }
 0x453   : > { %841 = dma.done.wait (%p729_p8), %s625_s13, 128  }
 0x454   : > { %843 = vsyncadd (%p729_p8), %s625_s13, 4294967168  ;;  %p16_p9 = scmp.ge.s32.totalorder %s934_s27, 4   ;;  %s1073_s21 = smov %s850_s22 }
 0x455   : > { %s1074_s22 = smov %s854_s23  ;;  %s1075_s23 = smov %s945_s30 }
 0x456   : > { %s1076_s24 = smov %s934_s27  ;;  %18 = sbr.rel (!%p16_p9) target bundleno = 3 (0x3), region = 82 }
 0x45b   :  { %631 = vsyncpa [#allocation4], 1 }
 0x45c   :  { %633 = vsyncpa [#allocation4 + $0x1], 1 }

</bundles_post_ra>
